<compile_context>
chip_gen: v6e
topology: v6e:2x2x1
jax: 0.10.0
libtpu: 0.0.40
codegen_flags: <defaults>
</compile_context>

<pallas_src>
import functools

import jax
import jax.numpy as jnp
from jax import lax
from jax.experimental import pallas as pl
from jax.experimental.pallas import tpu as pltpu

BN_EPS = 1e-5
LANE = 128
MATMUL_DTYPE = jnp.bfloat16          # matmul input dtype (f32 MXU accumulation)
ACT_DTYPE = jnp.bfloat16             # HBM storage dtype of h1/h2/h3
STAT_ROWS = 8                        # sublane-aligned partial-stat rows per core

VMEM_LIMIT_TILED = 32 * 1024 * 1024  # safe on v5e/v6e (128 MiB) and v7x (64 MiB)
VMEM_LIMIT_FUSED = 40 * 1024 * 1024
FUSED_BYTES_BUDGET = 24 * 1024 * 1024  # conservative estimate gate for fused path


def _round_up(n, m):
    return (n + m - 1) // m * m


def _pad2(a, shape):
    return jnp.pad(a, ((0, shape[0] - a.shape[0]), (0, shape[1] - a.shape[1])))


def _num_stat_cores():
    """2-way megacore split of the accumulating passes only on v7x."""
    try:
        kind = jax.devices()[0].device_kind.lower()
        if "v7" in kind:
            return 2
    except Exception:  # pragma: no cover - defensive
        pass
    return 1


# ---------------------------------------------------------------------------
# In-kernel helpers
# ---------------------------------------------------------------------------

def _bn_scale_shift(s, q, g, be, batch_size):
    """Fold BatchNorm into one per-feature affine: bn(h) = h*scale + shift.

    s, q are (rows, N) partial sums / sums-of-squares (rows = cores*STAT_ROWS
    in the tiled path, 1 in the fused path); they are reduced here.
    """
    s = jnp.sum(s, axis=0, keepdims=True)
    q = jnp.sum(q, axis=0, keepdims=True)
    inv_b = jnp.float32(1.0 / batch_size)
    mean = s * inv_b
    # fused (biased) variance; clamp against catastrophic cancellation.
    var = jnp.maximum(q * inv_b - mean * mean, 0.0)
    scale = g * lax.rsqrt(var + BN_EPS)      # gamma fused into the rsqrt scale
    shift = be - mean * scale
    return scale, shift


def _accum_stats(s_ref, q_ref, h):
    """Accumulate per-feature sum / sumsq of f32 h into (STAT_ROWS, N) blocks.

    The batch-tile rows are folded 8-at-a-time so the accumulator block stays
    sublane-aligned; the consumer sums the STAT_ROWS rows again.
    """
    n = h.shape[-1]
    h3 = h.reshape(-1, STAT_ROWS, n)
    s_ref[...] += jnp.sum(h3, axis=0)
    q_ref[...] += jnp.sum(h3 * h3, axis=0)


# ---------------------------------------------------------------------------
# Tiled-path kernels (grid = (cores, tiles_per_core))
# ---------------------------------------------------------------------------

def _linear_stats_kernel(x_ref, w_ref, h_ref, s_ref, q_ref):
    """pass 1: h = x @ W1 (bias dropped: cancelled by the following BN)."""
    @pl.when(pl.program_id(1) == 0)
    def _():
        s_ref[...] = jnp.zeros_like(s_ref)
        q_ref[...] = jnp.zeros_like(q_ref)

    h = jnp.dot(x_ref[...], w_ref[...], preferred_element_type=jnp.float32)
    h_ref[...] = h.astype(h_ref.dtype)        # bf16 HBM storage
    _accum_stats(s_ref, q_ref, h)             # stats from f32 pre-downcast h


def _bn_relu_linear_stats_kernel(h_ref, s_ref, q_ref, g_ref, be_ref, w_ref,
                                 ho_ref, so_ref, qo_ref,
                                 *, batch_size, tile_rows, tiles_per_core,
                                 mask_pad):
    """passes 2/3: a = relu(BN(h)); h_out = a @ W; accumulate stats(h_out)."""
    @pl.when(pl.program_id(1) == 0)
    def _():
        so_ref[...] = jnp.zeros_like(so_ref)
        qo_ref[...] = jnp.zeros_like(qo_ref)

    scale, shift = _bn_scale_shift(s_ref[...], q_ref[...],
                                   g_ref[...], be_ref[...], batch_size)
    a = jnp.maximum(h_ref[...].astype(jnp.float32) * scale + shift, 0.0)

    if mask_pad:
        # Zero the rows that only exist because of batch padding so they
        # contribute nothing to the next layer's statistics.  (Cheap VPU work;
        # only compiled in when padding exists.)
        tile_idx = pl.program_id(0) * tiles_per_core + pl.program_id(1)
        row = (tile_idx * tile_rows
               + lax.broadcasted_iota(jnp.int32, (tile_rows, 1), 0))
        a = jnp.where(row < batch_size, a, 0.0)

    ho = jnp.dot(a.astype(MATMUL_DTYPE), w_ref[...],
                 preferred_element_type=jnp.float32)
    ho_ref[...] = ho.astype(ho_ref.dtype)
    _accum_stats(so_ref, qo_ref, ho)


def _bn_relu_linear_out_kernel(h_ref, s_ref, q_ref, g_ref, be_ref, w_ref, b_ref,
                               o_ref, *, batch_size):
    """pass 4: a = relu(BN(h)); logits = a @ W4 + b4 (lane-dense store)."""
    scale, shift = _bn_scale_shift(s_ref[...], q_ref[...],
                                   g_ref[...], be_ref[...], batch_size)
    a = jnp.maximum(h_ref[...].astype(jnp.float32) * scale + shift, 0.0)
    out = jnp.dot(a.astype(MATMUL_DTYPE), w_ref[...],
                  preferred_element_type=jnp.float32) + b_ref[...]
    o_ref[...] = out.astype(o_ref.dtype)


# ---------------------------------------------------------------------------
# Fused single-kernel path (whole batch VMEM-resident)
# ---------------------------------------------------------------------------

def _fused_kernel(x_ref, w1_ref, g1_ref, be1_ref, w2_ref, g2_ref, be2_ref,
                  w3_ref, g3_ref, be3_ref, w4_ref, b4_ref, o_ref,
                  *, batch_size, mask_pad):
    def layer(a, w_ref, g_ref, be_ref):
        h = jnp.dot(a, w_ref[...], preferred_element_type=jnp.float32)
        s = jnp.sum(h, axis=0, keepdims=True)
        q = jnp.sum(h * h, axis=0, keepdims=True)
        scale, shift = _bn_scale_shift(s, q, g_ref[...], be_ref[...], batch_size)
        a2 = jnp.maximum(h * scale + shift, 0.0)
        if mask_pad:
            row = lax.broadcasted_iota(jnp.int32, (a2.shape[0], 1), 0)
            a2 = jnp.where(row < batch_size, a2, 0.0)
        return a2.astype(MATMUL_DTYPE)

    a = layer(x_ref[...], w1_ref, g1_ref, be1_ref)
    a = layer(a, w2_ref, g2_ref, be2_ref)
    a = layer(a, w3_ref, g3_ref, be3_ref)
    out = jnp.dot(a, w4_ref[...], preferred_element_type=jnp.float32) + b4_ref[...]
    o_ref[...] = out.astype(o_ref.dtype)


# ---------------------------------------------------------------------------
# Wrapper
# ---------------------------------------------------------------------------

def prepare_params(params):
    """Pad/cast parameters once, outside the jitted forward.

    params: flat tuple (w1,b1,g1,be1, w2,b2,g2,be2, w3,b3,g3,be3, w4,b4) with
    linear weights pre-transposed as [in_features, out_features] and biases /
    gammas / betas as (1, out_features).

    b1/b2/b3 are intentionally dropped: a bias added right before a BatchNorm
    is cancelled exactly by the mean subtraction.
    """
    (w1, _b1, g1, be1, w2, _b2, g2, be2, w3, _b3, g3, be3, w4, b4) = params
    F = w1.shape[0]
    N1 = _round_up(w1.shape[1], LANE)
    N2 = _round_up(w2.shape[1], LANE)
    N3 = _round_up(w3.shape[1], LANE)
    NOUT = _round_up(w4.shape[1], LANE)

    f32 = jnp.float32
    prepped = (
        _pad2(w1, (F, N1)).astype(MATMUL_DTYPE),
        _pad2(g1, (1, N1)).astype(f32), _pad2(be1, (1, N1)).astype(f32),
        _pad2(w2, (N1, N2)).astype(MATMUL_DTYPE),
        _pad2(g2, (1, N2)).astype(f32), _pad2(be2, (1, N2)).astype(f32),
        _pad2(w3, (N2, N3)).astype(MATMUL_DTYPE),
        _pad2(g3, (1, N3)).astype(f32), _pad2(be3, (1, N3)).astype(f32),
        _pad2(w4, (N3, NOUT)).astype(MATMUL_DTYPE),
        _pad2(b4, (1, NOUT)).astype(f32),
    )
    return prepped, int(w4.shape[1])


def _resident2(shape):
    return pl.BlockSpec(shape, lambda c, i: (0, 0))


def _tiled2(tile_rows, width, per_core):
    return pl.BlockSpec((tile_rows, width),
                        lambda c, i, _p=per_core: (c * _p + i, 0))


@functools.partial(jax.jit,
                   static_argnames=("n_out", "tile_rows", "force_tiled"))
def altan_forward(x, prepped, *, n_out, tile_rows=1024, force_tiled=False):
    (w1p, g1p, be1p, w2p, g2p, be2p, w3p, g3p, be3p, w4p, b4p) = prepped
    B, F = x.shape
    N1, N2, N3, NOUT = w1p.shape[1], w2p.shape[1], w3p.shape[1], w4p.shape[1]

    # --- batch tiling (tb multiple of 16 for bf16 sublane packing) ----------
    tb = _round_up(min(tile_rows, _round_up(B, 16)), 16)
    b_pad = _round_up(B, tb)
    nt = b_pad // tb
    mask_pad = b_pad != B
    # bf16 cast done once here (halves pass-1 input DMA, no per-tile cast).
    xp = jnp.pad(x.astype(MATMUL_DTYPE), ((0, b_pad - B), (0, 0)))

    # --- fused single-kernel path for batches that fit comfortably in VMEM --
    weight_bytes = sum(int(p.size) * p.dtype.itemsize for p in prepped)
    fused_bytes = (b_pad * F * 2
                   + 2 * b_pad * (N1 + N2 + N3) * 4
                   + b_pad * NOUT * 4
                   + weight_bytes)
    use_fused = (not force_tiled) and fused_bytes <= FUSED_BYTES_BUDGET

    if use_fused:
        out = pl.pallas_call(
            functools.partial(_fused_kernel, batch_size=B, mask_pad=mask_pad),
            out_shape=jax.ShapeDtypeStruct((b_pad, NOUT), jnp.float32),
            compiler_params=pltpu.CompilerParams(
                vmem_limit_bytes=VMEM_LIMIT_FUSED),
        )(xp, w1p, g1p, be1p, w2p, g2p, be2p, w3p, g3p, be3p, w4p, b4p)
        return out[:B, :n_out]

    # --- tiled 4-pass path ---------------------------------------------------
    nc = _num_stat_cores()
    if nt < nc or nt % nc != 0:
        nc = 1
    per_core = nt // nc
    grid12 = (nc, per_core)
    srows = nc * STAT_ROWS

    cpar_acc = pltpu.CompilerParams(
        dimension_semantics=("parallel", "arbitrary"),
        vmem_limit_bytes=VMEM_LIMIT_TILED)

    stat_spec = pl.BlockSpec((STAT_ROWS,), None)  # placeholder (not used)

    def stat_out_specs(n):
        return [pl.BlockSpec((STAT_ROWS, n), lambda c, i: (c, 0)),
                pl.BlockSpec((STAT_ROWS, n), lambda c, i: (c, 0))]

    def stat_out_shapes(n):
        return [jax.ShapeDtypeStruct((srows, n), jnp.float32),
                jax.ShapeDtypeStruct((srows, n), jnp.float32)]

    # ---- pass 1: linear1 + stats --------------------------------------------
    h1, s1, q1 = pl.pallas_call(
        _linear_stats_kernel,
        grid=grid12,
        in_specs=[_tiled2(tb, F, per_core), _resident2((F, N1))],
        out_specs=[_tiled2(tb, N1, per_core)] + stat_out_specs(N1),
        out_shape=[jax.ShapeDtypeStruct((b_pad, N1), ACT_DTYPE)]
                  + stat_out_shapes(N1),
        compiler_params=cpar_acc,
    )(xp, w1p)

    # ---- passes 2 & 3: BN+ReLU of previous layer fused with next linear -----
    def mid_pass(h, s, q, g, be, w, n_in, n_out_p):
        kern = functools.partial(_bn_relu_linear_stats_kernel,
                                 batch_size=B, tile_rows=tb,
                                 tiles_per_core=per_core, mask_pad=mask_pad)
        return pl.pallas_call(
            kern,
            grid=grid12,
            in_specs=[_tiled2(tb, n_in, per_core),
                      _resident2((srows, n_in)), _resident2((srows, n_in)),
                      _resident2((1, n_in)), _resident2((1, n_in)),
                      _resident2((n_in, n_out_p))],
            out_specs=[_tiled2(tb, n_out_p, per_core)] + stat_out_specs(n_out_p),
            out_shape=[jax.ShapeDtypeStruct((b_pad, n_out_p), ACT_DTYPE)]
                      + stat_out_shapes(n_out_p),
            compiler_params=cpar_acc,
        )(h, s, q, g, be, w)

    h2, s2, q2 = mid_pass(h1, s1, q1, g1p, be1p, w2p, N1, N2)
    h3, s3, q3 = mid_pass(h2, s2, q2, g2p, be2p, w3p, N2, N3)

    # ---- pass 4: BN3+ReLU + linear4 (logits); no accumulator -> parallel ----
    out = pl.pallas_call(
        functools.partial(_bn_relu_linear_out_kernel, batch_size=B),
        grid=(nt,),
        in_specs=[pl.BlockSpec((tb, N3), lambda i: (i, 0)),
                  pl.BlockSpec((srows, N3), lambda i: (0, 0)),
                  pl.BlockSpec((srows, N3), lambda i: (0, 0)),
                  pl.BlockSpec((1, N3), lambda i: (0, 0)),
                  pl.BlockSpec((1, N3), lambda i: (0, 0)),
                  pl.BlockSpec((N3, NOUT), lambda i: (0, 0)),
                  pl.BlockSpec((1, NOUT), lambda i: (0, 0))],
        out_specs=pl.BlockSpec((tb, NOUT), lambda i: (i, 0)),
        out_shape=jax.ShapeDtypeStruct((b_pad, NOUT), jnp.float32),
        compiler_params=pltpu.CompilerParams(
            dimension_semantics=("parallel",),
            vmem_limit_bytes=VMEM_LIMIT_TILED),
    )(h3, s3, q3, g3p, be3p, w4p, b4p)

    return out[:B, :n_out]


# ---------------------------------------------------------------------------
# Reference / init (PyTorch-faithful structure: biases kept, centered
# variance, whole-batch stats, f32 intermediates; only the matmul inputs are
# cast to MATMUL_DTYPE so the reference matches the kernel's MXU precision).
# ---------------------------------------------------------------------------

def init_params(key, x_numerics, hidden_size):
    dims = [(x_numerics, hidden_size), (hidden_size, 128), (128, 64), (64, 3)]
    params = []
    for i, (fan_in, fan_out) in enumerate(dims):
        key, kw, kb = jax.random.split(key, 3)
        bound = 1.0 / jnp.sqrt(jnp.float32(fan_in))
        w = jax.random.uniform(kw, (fan_in, fan_out), jnp.float32, -bound, bound)
        b = jax.random.uniform(kb, (1, fan_out), jnp.float32, -bound, bound)
        params.extend([w, b])
        if i < 3:  # batch_norm default init: gamma=1, beta=0
            params.extend([jnp.ones((1, fan_out), jnp.float32),
                           jnp.zeros((1, fan_out), jnp.float32)])
    return tuple(params)


def reference_forward(x, params):
    (w1, b1, g1, be1, w2, b2, g2, be2, w3, b3, g3, be3, w4, b4) = params

    def lin(a, w, b):
        return jnp.dot(a.astype(MATMUL_DTYPE), w.astype(MATMUL_DTYPE),
                       preferred_element_type=jnp.float32) + b

    def bn_relu(h, g, be):
        mean = jnp.mean(h, axis=0, keepdims=True)
        var = jnp.mean((h - mean) ** 2, axis=0, keepdims=True)
        return jnp.maximum((h - mean) / jnp.sqrt(var + BN_EPS) * g + be, 0.0)

    h = bn_relu(lin(x, w1, b1), g1, be1)
    h = bn_relu(lin(h, w2, b2), g2, be2)
    h = bn_relu(lin(h, w3, b3), g3, be3)
    return lin(h, w4, b4)


if __name__ == "__main__":
    # Small shapes.  B=20 exercises batch padding; the forced tiled run with
    # tile_rows=16 (b_pad=32, 2 tiles) exercises multi-tile stat accumulation
    # AND the masked ragged last tile; the default run takes the fused
    # VMEM-resident path.
    B, X_NUMERICS, HIDDEN = 20, 16, 32

    key = jax.random.PRNGKey(0)
    key, kx = jax.random.split(key)
    x = jax.random.normal(kx, (B, X_NUMERICS), jnp.float32)
    params = init_params(key, X_NUMERICS, HIDDEN)
    prepped, n_out = prepare_params(params)

    ref = reference_forward(x, params)

    out_fused = jax.block_until_ready(altan_forward(x, prepped, n_out=n_out))
    out_tiled = jax.block_until_ready(
        altan_forward(x, prepped, n_out=n_out, tile_rows=16, force_tiled=True))
    assert out_fused.shape == (B, 3), out_fused.shape
    assert out_tiled.shape == (B, 3), out_tiled.shape

    # Tolerances: bf16 matmuls + bf16-stored intermediates get re-normalized by
    # BatchNorm, so rare isolated logits can drift by a few 1e-2.  A structural
    # bug (wrong BN stats / masking / fusion) shifts essentially every logit by
    # O(0.3+), so keep a tight bound on the median and a loose bound on the max.
    for name, out in (("fused", out_fused), ("tiled", out_tiled)):
        err = jnp.abs(out - ref)
        med_err = float(jnp.median(err))
        max_err = float(jnp.max(err))
        assert med_err < 1e-2, f"{name}: systematic mismatch, median {med_err}"
        assert max_err < 2e-1, f"{name}: mismatch too large, max {max_err}"

    print("KERNEL_OK")
</pallas_src>

<mosaic_0001>
module attributes {stable_mosaic.version = 11 : i64} {
  func.func @_fused_kernel(%arg0: memref<32x16xbf16, #tpu.memory_space<vmem>>, %arg1: memref<16x128xbf16, #tpu.memory_space<vmem>>, %arg2: memref<1x128xf32, #tpu.memory_space<vmem>>, %arg3: memref<1x128xf32, #tpu.memory_space<vmem>>, %arg4: memref<128x128xbf16, #tpu.memory_space<vmem>>, %arg5: memref<1x128xf32, #tpu.memory_space<vmem>>, %arg6: memref<1x128xf32, #tpu.memory_space<vmem>>, %arg7: memref<128x128xbf16, #tpu.memory_space<vmem>>, %arg8: memref<1x128xf32, #tpu.memory_space<vmem>>, %arg9: memref<1x128xf32, #tpu.memory_space<vmem>>, %arg10: memref<128x128xbf16, #tpu.memory_space<vmem>>, %arg11: memref<1x128xf32, #tpu.memory_space<vmem>>, %arg12: memref<32x128xf32, #tpu.memory_space<vmem>>) attributes {dimension_semantics = [], scalar_prefetch = 0 : i64, scratch_operands = 0 : i64, tpu.core_type = #tpu.core_type<tc>} {
    %c0 = arith.constant 0 : index
    %c0_0 = arith.constant 0 : index
    %0 = vector.load %arg0[%c0, %c0_0] : memref<32x16xbf16, #tpu.memory_space<vmem>>, vector<32x16xbf16>
    %c0_1 = arith.constant 0 : index
    %c0_2 = arith.constant 0 : index
    %1 = vector.load %arg1[%c0_1, %c0_2] : memref<16x128xbf16, #tpu.memory_space<vmem>>, vector<16x128xbf16>
    %cst = arith.constant dense<0.000000e+00> : vector<32x128xf32>
    %2 = tpu.matmul %0, %1, %cst {dimension_numbers = #tpu.dot_dimension_numbers<[1], [0], [0], [1], [0, 0, 1, 1], [], []>} : vector<32x16xbf16>, vector<16x128xbf16>, vector<32x128xf32> -> vector<32x128xf32>
    %cst_3 = arith.constant dense<0.000000e+00> : vector<128xf32>
    %3 = vector.multi_reduction <add>, %2, %cst_3 [0] : vector<32x128xf32> to vector<128xf32>
    %4 = vector.shape_cast %3 : vector<128xf32> to vector<1x128xf32>
    %5 = arith.mulf %2, %2 : vector<32x128xf32>
    %cst_4 = arith.constant dense<0.000000e+00> : vector<128xf32>
    %6 = vector.multi_reduction <add>, %5, %cst_4 [0] : vector<32x128xf32> to vector<128xf32>
    %7 = vector.shape_cast %6 : vector<128xf32> to vector<1x128xf32>
    %c0_5 = arith.constant 0 : index
    %c0_6 = arith.constant 0 : index
    %8 = vector.load %arg2[%c0_5, %c0_6] : memref<1x128xf32, #tpu.memory_space<vmem>>, vector<1x128xf32>
    %c0_7 = arith.constant 0 : index
    %c0_8 = arith.constant 0 : index
    %9 = vector.load %arg3[%c0_7, %c0_8] : memref<1x128xf32, #tpu.memory_space<vmem>>, vector<1x128xf32>
    %cst_9 = arith.constant dense<0.000000e+00> : vector<128xf32>
    %10 = vector.multi_reduction <add>, %4, %cst_9 [0] : vector<1x128xf32> to vector<128xf32>
    %11 = vector.shape_cast %10 : vector<128xf32> to vector<1x128xf32>
    %cst_10 = arith.constant dense<0.000000e+00> : vector<128xf32>
    %12 = vector.multi_reduction <add>, %7, %cst_10 [0] : vector<1x128xf32> to vector<128xf32>
    %13 = vector.shape_cast %12 : vector<128xf32> to vector<1x128xf32>
    %cst_11 = arith.constant 5.000000e-02 : f32
    %14 = vector.broadcast %cst_11 : f32 to vector<1x128xf32>
    %15 = arith.mulf %11, %14 : vector<1x128xf32>
    %cst_12 = arith.constant 5.000000e-02 : f32
    %16 = vector.broadcast %cst_12 : f32 to vector<1x128xf32>
    %17 = arith.mulf %13, %16 : vector<1x128xf32>
    %18 = arith.mulf %15, %15 : vector<1x128xf32>
    %19 = arith.subf %17, %18 : vector<1x128xf32>
    %cst_13 = arith.constant 0.000000e+00 : f32
    %20 = vector.broadcast %cst_13 : f32 to vector<1x128xf32>
    %21 = arith.maximumf %19, %20 : vector<1x128xf32>
    %cst_14 = arith.constant 9.99999974E-6 : f32
    %22 = vector.broadcast %cst_14 : f32 to vector<1x128xf32>
    %23 = arith.addf %21, %22 : vector<1x128xf32>
    %24 = math.rsqrt %23 : vector<1x128xf32>
    %25 = arith.mulf %8, %24 : vector<1x128xf32>
    %26 = arith.mulf %15, %25 : vector<1x128xf32>
    %27 = arith.subf %9, %26 : vector<1x128xf32>
    %28 = vector.broadcast %25 : vector<1x128xf32> to vector<32x128xf32>
    %29 = arith.mulf %2, %28 : vector<32x128xf32>
    %30 = vector.broadcast %27 : vector<1x128xf32> to vector<32x128xf32>
    %31 = arith.addf %29, %30 : vector<32x128xf32>
    %cst_15 = arith.constant 0.000000e+00 : f32
    %32 = vector.broadcast %cst_15 : f32 to vector<32x128xf32>
    %33 = arith.maximumf %31, %32 : vector<32x128xf32>
    %34 = tpu.iota {dimensions = array<i32: 0>} : vector<32x1xi32>
    %c20_i32 = arith.constant 20 : i32
    %35 = vector.broadcast %c20_i32 : i32 to vector<32x1xi32>
    %36 = arith.cmpi slt, %34, %35 : vector<32x1xi32>
    %cst_16 = arith.constant 0.000000e+00 : f32
    %37 = vector.shape_cast %36 : vector<32x1xi1> to vector<32x1xi1>
    %38 = vector.broadcast %37 : vector<32x1xi1> to vector<32x128xi1>
    %39 = vector.broadcast %cst_16 : f32 to vector<32x128xf32>
    %40 = arith.select %38, %33, %39 : vector<32x128xi1>, vector<32x128xf32>
    %41 = arith.truncf %40 : vector<32x128xf32> to vector<32x128xbf16>
    %c0_17 = arith.constant 0 : index
    %c0_18 = arith.constant 0 : index
    %42 = vector.load %arg4[%c0_17, %c0_18] : memref<128x128xbf16, #tpu.memory_space<vmem>>, vector<128x128xbf16>
    %cst_19 = arith.constant dense<0.000000e+00> : vector<32x128xf32>
    %43 = tpu.matmul %41, %42, %cst_19 {dimension_numbers = #tpu.dot_dimension_numbers<[1], [0], [0], [1], [0, 0, 1, 1], [], []>} : vector<32x128xbf16>, vector<128x128xbf16>, vector<32x128xf32> -> vector<32x128xf32>
    %cst_20 = arith.constant dense<0.000000e+00> : vector<128xf32>
    %44 = vector.multi_reduction <add>, %43, %cst_20 [0] : vector<32x128xf32> to vector<128xf32>
    %45 = vector.shape_cast %44 : vector<128xf32> to vector<1x128xf32>
    %46 = arith.mulf %43, %43 : vector<32x128xf32>
    %cst_21 = arith.constant dense<0.000000e+00> : vector<128xf32>
    %47 = vector.multi_reduction <add>, %46, %cst_21 [0] : vector<32x128xf32> to vector<128xf32>
    %48 = vector.shape_cast %47 : vector<128xf32> to vector<1x128xf32>
    %c0_22 = arith.constant 0 : index
    %c0_23 = arith.constant 0 : index
    %49 = vector.load %arg5[%c0_22, %c0_23] : memref<1x128xf32, #tpu.memory_space<vmem>>, vector<1x128xf32>
    %c0_24 = arith.constant 0 : index
    %c0_25 = arith.constant 0 : index
    %50 = vector.load %arg6[%c0_24, %c0_25] : memref<1x128xf32, #tpu.memory_space<vmem>>, vector<1x128xf32>
    %cst_26 = arith.constant dense<0.000000e+00> : vector<128xf32>
    %51 = vector.multi_reduction <add>, %45, %cst_26 [0] : vector<1x128xf32> to vector<128xf32>
    %52 = vector.shape_cast %51 : vector<128xf32> to vector<1x128xf32>
    %cst_27 = arith.constant dense<0.000000e+00> : vector<128xf32>
    %53 = vector.multi_reduction <add>, %48, %cst_27 [0] : vector<1x128xf32> to vector<128xf32>
    %54 = vector.shape_cast %53 : vector<128xf32> to vector<1x128xf32>
    %cst_28 = arith.constant 5.000000e-02 : f32
    %55 = vector.broadcast %cst_28 : f32 to vector<1x128xf32>
    %56 = arith.mulf %52, %55 : vector<1x128xf32>
    %cst_29 = arith.constant 5.000000e-02 : f32
    %57 = vector.broadcast %cst_29 : f32 to vector<1x128xf32>
    %58 = arith.mulf %54, %57 : vector<1x128xf32>
    %59 = arith.mulf %56, %56 : vector<1x128xf32>
    %60 = arith.subf %58, %59 : vector<1x128xf32>
    %cst_30 = arith.constant 0.000000e+00 : f32
    %61 = vector.broadcast %cst_30 : f32 to vector<1x128xf32>
    %62 = arith.maximumf %60, %61 : vector<1x128xf32>
    %cst_31 = arith.constant 9.99999974E-6 : f32
    %63 = vector.broadcast %cst_31 : f32 to vector<1x128xf32>
    %64 = arith.addf %62, %63 : vector<1x128xf32>
    %65 = math.rsqrt %64 : vector<1x128xf32>
    %66 = arith.mulf %49, %65 : vector<1x128xf32>
    %67 = arith.mulf %56, %66 : vector<1x128xf32>
    %68 = arith.subf %50, %67 : vector<1x128xf32>
    %69 = vector.broadcast %66 : vector<1x128xf32> to vector<32x128xf32>
    %70 = arith.mulf %43, %69 : vector<32x128xf32>
    %71 = vector.broadcast %68 : vector<1x128xf32> to vector<32x128xf32>
    %72 = arith.addf %70, %71 : vector<32x128xf32>
    %cst_32 = arith.constant 0.000000e+00 : f32
    %73 = vector.broadcast %cst_32 : f32 to vector<32x128xf32>
    %74 = arith.maximumf %72, %73 : vector<32x128xf32>
    %75 = tpu.iota {dimensions = array<i32: 0>} : vector<32x1xi32>
    %c20_i32_33 = arith.constant 20 : i32
    %76 = vector.broadcast %c20_i32_33 : i32 to vector<32x1xi32>
    %77 = arith.cmpi slt, %75, %76 : vector<32x1xi32>
    %cst_34 = arith.constant 0.000000e+00 : f32
    %78 = vector.shape_cast %77 : vector<32x1xi1> to vector<32x1xi1>
    %79 = vector.broadcast %78 : vector<32x1xi1> to vector<32x128xi1>
    %80 = vector.broadcast %cst_34 : f32 to vector<32x128xf32>
    %81 = arith.select %79, %74, %80 : vector<32x128xi1>, vector<32x128xf32>
    %82 = arith.truncf %81 : vector<32x128xf32> to vector<32x128xbf16>
    %c0_35 = arith.constant 0 : index
    %c0_36 = arith.constant 0 : index
    %83 = vector.load %arg7[%c0_35, %c0_36] : memref<128x128xbf16, #tpu.memory_space<vmem>>, vector<128x128xbf16>
    %cst_37 = arith.constant dense<0.000000e+00> : vector<32x128xf32>
    %84 = tpu.matmul %82, %83, %cst_37 {dimension_numbers = #tpu.dot_dimension_numbers<[1], [0], [0], [1], [0, 0, 1, 1], [], []>} : vector<32x128xbf16>, vector<128x128xbf16>, vector<32x128xf32> -> vector<32x128xf32>
    %cst_38 = arith.constant dense<0.000000e+00> : vector<128xf32>
    %85 = vector.multi_reduction <add>, %84, %cst_38 [0] : vector<32x128xf32> to vector<128xf32>
    %86 = vector.shape_cast %85 : vector<128xf32> to vector<1x128xf32>
    %87 = arith.mulf %84, %84 : vector<32x128xf32>
    %cst_39 = arith.constant dense<0.000000e+00> : vector<128xf32>
    %88 = vector.multi_reduction <add>, %87, %cst_39 [0] : vector<32x128xf32> to vector<128xf32>
    %89 = vector.shape_cast %88 : vector<128xf32> to vector<1x128xf32>
    %c0_40 = arith.constant 0 : index
    %c0_41 = arith.constant 0 : index
    %90 = vector.load %arg8[%c0_40, %c0_41] : memref<1x128xf32, #tpu.memory_space<vmem>>, vector<1x128xf32>
    %c0_42 = arith.constant 0 : index
    %c0_43 = arith.constant 0 : index
    %91 = vector.load %arg9[%c0_42, %c0_43] : memref<1x128xf32, #tpu.memory_space<vmem>>, vector<1x128xf32>
    %cst_44 = arith.constant dense<0.000000e+00> : vector<128xf32>
    %92 = vector.multi_reduction <add>, %86, %cst_44 [0] : vector<1x128xf32> to vector<128xf32>
    %93 = vector.shape_cast %92 : vector<128xf32> to vector<1x128xf32>
    %cst_45 = arith.constant dense<0.000000e+00> : vector<128xf32>
    %94 = vector.multi_reduction <add>, %89, %cst_45 [0] : vector<1x128xf32> to vector<128xf32>
    %95 = vector.shape_cast %94 : vector<128xf32> to vector<1x128xf32>
    %cst_46 = arith.constant 5.000000e-02 : f32
    %96 = vector.broadcast %cst_46 : f32 to vector<1x128xf32>
    %97 = arith.mulf %93, %96 : vector<1x128xf32>
    %cst_47 = arith.constant 5.000000e-02 : f32
    %98 = vector.broadcast %cst_47 : f32 to vector<1x128xf32>
    %99 = arith.mulf %95, %98 : vector<1x128xf32>
    %100 = arith.mulf %97, %97 : vector<1x128xf32>
    %101 = arith.subf %99, %100 : vector<1x128xf32>
    %cst_48 = arith.constant 0.000000e+00 : f32
    %102 = vector.broadcast %cst_48 : f32 to vector<1x128xf32>
    %103 = arith.maximumf %101, %102 : vector<1x128xf32>
    %cst_49 = arith.constant 9.99999974E-6 : f32
    %104 = vector.broadcast %cst_49 : f32 to vector<1x128xf32>
    %105 = arith.addf %103, %104 : vector<1x128xf32>
    %106 = math.rsqrt %105 : vector<1x128xf32>
    %107 = arith.mulf %90, %106 : vector<1x128xf32>
    %108 = arith.mulf %97, %107 : vector<1x128xf32>
    %109 = arith.subf %91, %108 : vector<1x128xf32>
    %110 = vector.broadcast %107 : vector<1x128xf32> to vector<32x128xf32>
    %111 = arith.mulf %84, %110 : vector<32x128xf32>
    %112 = vector.broadcast %109 : vector<1x128xf32> to vector<32x128xf32>
    %113 = arith.addf %111, %112 : vector<32x128xf32>
    %cst_50 = arith.constant 0.000000e+00 : f32
    %114 = vector.broadcast %cst_50 : f32 to vector<32x128xf32>
    %115 = arith.maximumf %113, %114 : vector<32x128xf32>
    %116 = tpu.iota {dimensions = array<i32: 0>} : vector<32x1xi32>
    %c20_i32_51 = arith.constant 20 : i32
    %117 = vector.broadcast %c20_i32_51 : i32 to vector<32x1xi32>
    %118 = arith.cmpi slt, %116, %117 : vector<32x1xi32>
    %cst_52 = arith.constant 0.000000e+00 : f32
    %119 = vector.shape_cast %118 : vector<32x1xi1> to vector<32x1xi1>
    %120 = vector.broadcast %119 : vector<32x1xi1> to vector<32x128xi1>
    %121 = vector.broadcast %cst_52 : f32 to vector<32x128xf32>
    %122 = arith.select %120, %115, %121 : vector<32x128xi1>, vector<32x128xf32>
    %123 = arith.truncf %122 : vector<32x128xf32> to vector<32x128xbf16>
    %c0_53 = arith.constant 0 : index
    %c0_54 = arith.constant 0 : index
    %124 = vector.load %arg10[%c0_53, %c0_54] : memref<128x128xbf16, #tpu.memory_space<vmem>>, vector<128x128xbf16>
    %cst_55 = arith.constant dense<0.000000e+00> : vector<32x128xf32>
    %125 = tpu.matmul %123, %124, %cst_55 {dimension_numbers = #tpu.dot_dimension_numbers<[1], [0], [0], [1], [0, 0, 1, 1], [], []>} : vector<32x128xbf16>, vector<128x128xbf16>, vector<32x128xf32> -> vector<32x128xf32>
    %c0_56 = arith.constant 0 : index
    %c0_57 = arith.constant 0 : index
    %126 = vector.load %arg11[%c0_56, %c0_57] : memref<1x128xf32, #tpu.memory_space<vmem>>, vector<1x128xf32>
    %127 = vector.broadcast %126 : vector<1x128xf32> to vector<32x128xf32>
    %128 = arith.addf %125, %127 : vector<32x128xf32>
    %c0_58 = arith.constant 0 : index
    %c0_59 = arith.constant 0 : index
    %129 = vector.load %arg12[%c0_58, %c0_59] : memref<32x128xf32, #tpu.memory_space<vmem>>, vector<32x128xf32>
    tpu.vector_store %arg12[%c0_58, %c0_59], %128 {strides = array<i32>} : memref<32x128xf32, #tpu.memory_space<vmem>>, vector<32x128xf32>,
    return
  }
}

</mosaic_0001>

<bundles_post_ra>
// kernel: altan_forward.1
= control target key start
LH: loop header
LB: loop body
LE: loop exit
PB: predicated region body
PF: predicated region fallthrough
CT: control target
= control target key end

     0   :  { %17 = vsyncpa [#allocation3], 0  ;;  %s1104_s0 = inlined_call_operand.vmem [shape: bf16[32,16], index: 0, kind: input, shape index: {}]   ;;  %s1105_s1 = inlined_call_operand.vmem [shape: bf16[16,128], index: 1, kind: input, shape index: {}]   ;;  %s1106_s2 = inlined_call_operand.vmem [shape: f32[1,128], index: 2, kind: input, shape index: {}]   ;;  %s1107_s3 = inlined_call_operand.vmem [shape: f32[1,128], index: 3, kind: input, shape index: {}]   ;;  %s1108_s4 = inlined_call_operand.vmem [shape: bf16[128,128], index: 4, kind: input, shape index: {}]   ;;  %s1109_s5 = inlined_call_operand.vmem [shape: f32[1,128], index: 5, kind: input, shape index: {}]   ;;  %s1110_s6 = inlined_call_operand.vmem [shape: f32[1,128], index: 6, kind: input, shape index: {}]   ;;  %s1111_s7 = inlined_call_operand.hbm [shape: bf16[128,128], index: 7, kind: input, shape index: {}]   ;;  %s1112_s8 = inlined_call_operand.vmem [shape: f32[1,128], index: 8, kind: input, shape index: {}]   ;;  %s1113_s9 = inlined_call_operand.vmem [shape: f32[1,128], index: 9, kind: input, shape index: {}]   ;;  %s1114_s10 = inlined_call_operand.hbm [shape: bf16[128,128], index: 10, kind: input, shape index: {}]   ;;  %s1115_s11 = inlined_call_operand.vmem [shape: f32[1,128], index: 11, kind: input, shape index: {}]   ;;  %s1116_s12 = inlined_call_operand.vmem [shape: f32[32,128], index: 12, kind: output, shape index: {}]  }
   0x1   :  { %18 = vsyncpa [#allocation5], 0  ;;  %s940_s21 = smov [#allocation2]  }
   0x2   :  { %s38_s22 = sshll.u32 %s940_s21, 4  ;;  %s39_s22 = int_to_ptr.vmem [resolvable:$true] %s38_s22 }
   0x3   :  { %s904_s23 = scalar_lea.vmem %s39_s22, 1024  ;;  %p909_p1 = scmp.lt.s32.totalorder %s39_s22, %s39_s22 }
   0x4   :  { %p905_p0 = scmp.ne.s32.totalorder %s39_s22, %s904_s23  ;;  %p910_p2 = scmp.lt.s32.totalorder %s904_s23, %s904_s23 }
   0x6   :  { %p911_p3 = por %p910_p2, %p909_p1 }
   0x8   :  { %p912_p4 = pnand %p911_p3, %p905_p0 }
   0xa   :  { %915 = shalt.err (!%p912_p4)
}
   0xb   :  { %s941_s24 = smov 64   ;;  %s942_s25 = smov 4  }
   0xc   :  { %44 = dma.hbm_to_vmem [thread:$0]  %s1111_s7, 1024, %s39_s22, [#allocation3], %s941_s24, %s941_s24, %s942_s25  }
   0xd   :  { %s943_s28 = smov [#allocation4]  }
   0xe   :  { %s54_s29 = sshll.u32 %s943_s28, 4  ;;  %s55_s29 = int_to_ptr.vmem [resolvable:$true] %s54_s29 }
   0xf   :  { %s924_s30 = scalar_lea.vmem %s55_s29, 1024  ;;  %p929_p6 = scmp.lt.s32.totalorder %s55_s29, %s55_s29 }
  0x10   :  { %p925_p5 = scmp.ne.s32.totalorder %s55_s29, %s924_s30  ;;  %p930_p7 = scmp.lt.s32.totalorder %s924_s30, %s924_s30 }
  0x12   :  { %p931_p8 = por %p930_p7, %p929_p6 }
  0x14   :  { %p932_p9 = pnand %p931_p8, %p925_p5 }
  0x16   :  { %935 = shalt.err (!%p932_p9)
}
  0x17   :  { %60 = dma.hbm_to_vmem [thread:$0]  %s1114_s10, 1024, %s55_s29, [#allocation5], %s941_s24, %s941_s24, %s942_s25  }
  0x18   :  { %936 = dma.done.wait [#allocation3], 1024  }
  0x19   :  { %937 = vsyncadd [#allocation3], 4294966272 }
  0x1a   :  { %938 = dma.done.wait [#allocation5], 1024  }
  0x1b   :  { %939 = vsyncadd [#allocation5], 4294966272  ;;  %v863_v0 = vld [vmem:[%s1105_s1] sm:$0xff]   ;;  %vm92_vm0 = vcmask 130048   ;;  %v865_v2 = vld [vmem:[%s1104_s0 + $0x8] sm:$0xff]   ;;  %v185_v43 = vlaneseq  ;;  %vm944_vm2 = vmmov 1  }
  0x1c   :  { %v864_v1 = vld [vmem:[%s1104_s0] sm:$0xff]   ;;  %791 = vmatprep.subr.bf16.mxu0 %v863_v0  ;;  %v866_v3 = vld [vmem:[%s1108_s4 + $0x38] sm:$0xff]   ;;  %v867_v4 = vld [vmem:[%s1108_s4 + $0x30] sm:$0xff]  }
  0x1d   :  { %792 = vmatpush3.bf16.msra.mxu0 %v863_v0  ;;  %793 = vmatprep.mubr.msk.bf16.mxu0 %vm92_vm0, %v864_v1  ;;  %v868_v5 = vld [vmem:[%s1108_s4 + $0x28] sm:$0xff]   ;;  %v869_v6 = vld [vmem:[%s1108_s4 + $0x20] sm:$0xff]   ;;  %v870_v7 = vld [vmem:[%s1108_s4 + $0x18] sm:$0xff]   ;;  %v186_v44 = vshrl.u32 %v185_v43, 7 }
  0x1e   :  { %797 = vmatprep.subr.bf16.mxu1 %v866_v3  ;;  %v871_v8 = vld [vmem:[%s1108_s4 + $0x10] sm:$0xff]   ;;  %v872_v9 = vld [vmem:[%s1108_s4 + $0x8] sm:$0xff]   ;;  %v873_v10 = vld [vmem:[%s1108_s4] sm:$0xff]  }
  0x1f   :  { %798 = vmatpush3.bf16.msra.mxu1 %v866_v3  ;;  %v170_v45 = vld [vmem:[%s1106_s2] sm:$0x1]  ;;  %v1053_v46 = vsub.s32 0, %v186_v44  ;;  %v211_v53 = vadd.s32 16, %v186_v44 }
  0x20   :  { %794 = vmatmul.mubr.msk.bf16.vlgmr.msra.gmra.mxu0 %vm92_vm0, %v865_v2  ;;  %799 = vmatprep.subr.bf16.mxu1 %v867_v4  ;;  %v171_v49 = vld [vmem:[%s1107_s3] sm:$0x1]  ;;  %v945_v2 = vmov 0.0  }
  0x21   :  { %vm215_vm1 = vcmp.lt.s32.totalorder %v211_v53, 20  ;;  %v366_v44 = vld [vmem:[%s1109_s5] sm:$0x1] }
  0x22   :  { %vm1060_vm3 = vmpackc.low %vm944_vm2, %vm215_vm1 }
  0x23   :  { %800 = vmatpush3.bf16.msra.mxu1 %v867_v4  ;;  %v874_v4 = vld [vmem:[#allocation2 + $0x38] sm:$0xff]  }
  0x24   :  { %801 = vmatprep.subr.bf16.mxu1 %v868_v5  ;;  %817 = vmatprep.subr.bf16.mxu0 %v874_v4 }
  0x25   :  { %818 = vmatpush3.bf16.msra.mxu0 %v874_v4  ;;  %v884_v4 = vld [vmem:[#allocation4 + $0x28] sm:$0xff]  }
  0x27   :  { %802 = vmatpush3.bf16.msra.mxu1 %v868_v5  ;;  %v875_v5 = vld [vmem:[#allocation2 + $0x30] sm:$0xff]  }
  0x28   :  { %803 = vmatprep.subr.bf16.mxu1 %v869_v6  ;;  %819 = vmatprep.subr.bf16.mxu0 %v875_v5 }
  0x29   :  { %820 = vmatpush3.bf16.msra.mxu0 %v875_v5  ;;  %v885_v5 = vld [vmem:[#allocation4 + $0x20] sm:$0xff]  }
  0x2b   :  { %804 = vmatpush3.bf16.msra.mxu1 %v869_v6  ;;  %v876_v6 = vld [vmem:[#allocation2 + $0x28] sm:$0xff]  }
  0x2c   :  { %805 = vmatprep.subr.bf16.mxu1 %v870_v7  ;;  %821 = vmatprep.subr.bf16.mxu0 %v876_v6 }
  0x2d   :  { %822 = vmatpush3.bf16.msra.mxu0 %v876_v6  ;;  %v886_v6 = vld [vmem:[#allocation4 + $0x18] sm:$0xff]  }
  0x2f   :  { %806 = vmatpush3.bf16.msra.mxu1 %v870_v7  ;;  %v877_v7 = vld [vmem:[#allocation2 + $0x20] sm:$0xff]  }
  0x30   :  { %807 = vmatprep.subr.bf16.mxu1 %v871_v8  ;;  %823 = vmatprep.subr.bf16.mxu0 %v877_v7 }
  0x31   :  { %824 = vmatpush3.bf16.msra.mxu0 %v877_v7  ;;  %v887_v7 = vld [vmem:[#allocation4 + $0x10] sm:$0xff]  }
  0x33   :  { %808 = vmatpush3.bf16.msra.mxu1 %v871_v8  ;;  %v878_v8 = vld [vmem:[#allocation2 + $0x18] sm:$0xff]  }
  0x34   :  { %809 = vmatprep.subr.bf16.mxu1 %v872_v9  ;;  %825 = vmatprep.subr.bf16.mxu0 %v878_v8 }
  0x35   :  { %826 = vmatpush3.bf16.msra.mxu0 %v878_v8  ;;  %v888_v8 = vld [vmem:[#allocation4 + $0x8] sm:$0xff]  }
  0x37   :  { %810 = vmatpush3.bf16.msra.mxu1 %v872_v9  ;;  %v879_v9 = vld [vmem:[#allocation2 + $0x10] sm:$0xff]  }
  0x38   :  { %811 = vmatprep.subr.bf16.mxu1 %v873_v10  ;;  %827 = vmatprep.subr.bf16.mxu0 %v879_v9 }
  0x39   :  { %828 = vmatpush3.bf16.msra.mxu0 %v879_v9  ;;  %v889_v9 = vld [vmem:[#allocation4] sm:$0xff]  }
  0x3b   :  { %812 = vmatpush3.bf16.msra.mxu1 %v873_v10  ;;  %v880_v10 = vld [vmem:[#allocation2 + $0x8] sm:$0xff]  }
  0x3c   :  { %829 = vmatprep.subr.bf16.mxu0 %v880_v10 }
  0x3d   :  { %830 = vmatpush3.bf16.msra.mxu0 %v880_v10 }
  0xe0   :  { %v795_v11 = vpop.f32.mrf.mxu0 }
  0xe1   :  { %v159_v18 = vmul.f32 %v795_v11, %v795_v11 }
  0xe2   :  { %v133_v12 = vpop.f32.mrf.mxu0 }
  0xe3   :  { %v157_v15 = vmul.f32 %v133_v12, %v133_v12 }
  0xe4   :  { %v796_v13 = vpop.f32.mrf.mxu0 }
  0xe5   :  { %v160_v21 = vmul.f32 %v796_v13, %v796_v13 }
  0xe6   :  { %v136_v14 = vpop.f32.mrf.mxu0 }
  0xe7   :  { %v148_v16 = vadd.f32 %v136_v14, %v133_v12  ;;  %v158_v17 = vmul.f32 %v136_v14, %v136_v14 }
  0xe9   :  { %v149_v19 = vadd.f32 %v795_v11, %v148_v16  ;;  %v161_v20 = vadd.f32 %v158_v17, %v157_v15 }
  0xeb   :  { %v150_v22 = vadd.f32 %v796_v13, %v149_v19  ;;  %v162_v23 = vadd.f32 %v161_v20, %v159_v18 }
  0xed   :  { %v151_v24 = vrot.slane %v150_v22, 4  ;;  %v163_v25 = vadd.f32 %v162_v23, %v160_v21 }
  0xef   :  { %v152_v26 = vadd.f32 %v151_v24, %v150_v22  ;;  %v164_v27 = vrot.slane %v163_v25, 4 }
  0xf1   :  { %v153_v28 = vrot.slane %v152_v26, 2  ;;  %v165_v29 = vadd.f32 %v164_v27, %v163_v25 }
  0xf3   :  { %v154_v30 = vadd.f32 %v153_v28, %v152_v26  ;;  %v166_v31 = vrot.slane %v165_v29, 2 }
  0xf5   :  { %v155_v32 = vrot.slane %v154_v30, 1  ;;  %v167_v33 = vadd.f32 %v166_v31, %v165_v29 }
  0xf7   :  { %v156_v34 = vadd.f32 %v155_v32, %v154_v30  ;;  %v168_v35 = vrot.slane %v167_v33, 1 }
  0xf9   :  { %v169_v36 = vadd.f32 %v168_v35, %v167_v33  ;;  %v174_v37 = vmul.f32 0.05, %v156_v34 }
  0xfb   :  { %v175_v38 = vmul.f32 0.05, %v169_v36  ;;  %v176_v39 = vmul.f32 %v174_v37, %v174_v37 }
  0xfd   :  { %v177_v40 = vsub.f32 %v175_v38, %v176_v39 }
  0xff   :  { %v178_v41 = vmax.f32 %v177_v40, 0.0 }
 0x101   :  { %v179_v42 = vadd.f32 1e-05, %v178_v41 }
 0x103   :  { %890 = vrsqrt.f32 %v179_v42 }
 0x110   :  { %v891_v47 = vpop.eup %890 }
 0x111   :  { %v181_v48 = vmul.f32 %v891_v47, %v170_v45 }
 0x113   :  { %v188_v50 = vrot.slane %v181_v48, %v1053_v46  ;;  %v182_v51 = vmul.f32 %v181_v48, %v174_v37  ;;  %v367_v48 = vld [vmem:[%s1110_s6] sm:$0x1] }
 0x115   :  { %v183_v52 = vsub.f32 %v171_v49, %v182_v51  ;;  %v191_v54 = vmul.f32 %v188_v50, %v136_v14  ;;  %v190_v55 = vmul.f32 %v188_v50, %v133_v12  ;;  %v192_v57 = vmul.f32 %v795_v11, %v188_v50  ;;  %v881_v11 = vld [vmem:[#allocation2] sm:$0xff]  }
 0x116   :  { %831 = vmatprep.subr.bf16.mxu0 %v881_v11 }
 0x117   :  { %v198_v56 = vrot.slane %v183_v52, %v1053_v46  ;;  %832 = vmatpush3.bf16.msra.mxu0 %v881_v11 }
 0x119   :  { %v200_v58 = vadd.f32 %v198_v56, %v190_v55  ;;  %v201_v59 = vadd.f32 %v198_v56, %v191_v54  ;;  %v202_v60 = vadd.f32 %v198_v56, %v192_v57 }
 0x11b   :  { %v204_v61 = vmax.f32 %v200_v58, 0.0  ;;  %v205_v62 = vmax.f32 %v201_v59, 0.0  ;;  %v206_v63 = vmax.f32 %v202_v60, 0.0 }
 0x11d   :  { %v229_v0 = vpack.c.bf16 %v205_v62, %v204_v61  ;;  %v733_v3 = vpack.c.bf16 %v945_v2, %v206_v63 }
 0x11f   :  { %813 = vmatprep.mubr.bf16.mxu1 %v229_v0  ;;  %v882_v0 = vld [vmem:[#allocation4 + $0x38] sm:$0xff]  }
 0x120   :  { %814 = vmatmul.mubr.msk.bf16.vlgmr.msra.gmra.mxu1 %vm1060_vm3, %v733_v3  ;;  %837 = vmatprep.subr.bf16.mxu1 %v882_v0  ;;  %v883_v3 = vld [vmem:[#allocation4 + $0x30] sm:$0xff]  }
 0x121   :  { %838 = vmatpush3.bf16.msra.mxu1 %v882_v0 }
 0x122   :  { %839 = vmatprep.subr.bf16.mxu1 %v883_v3 }
 0x125   :  { %840 = vmatpush3.bf16.msra.mxu1 %v883_v3 }
 0x126   :  { %841 = vmatprep.subr.bf16.mxu1 %v884_v4 }
 0x129   :  { %842 = vmatpush3.bf16.msra.mxu1 %v884_v4 }
 0x12a   :  { %843 = vmatprep.subr.bf16.mxu1 %v885_v5 }
 0x12d   :  { %844 = vmatpush3.bf16.msra.mxu1 %v885_v5 }
 0x12e   :  { %845 = vmatprep.subr.bf16.mxu1 %v886_v6 }
 0x131   :  { %846 = vmatpush3.bf16.msra.mxu1 %v886_v6 }
 0x132   :  { %847 = vmatprep.subr.bf16.mxu1 %v887_v7 }
 0x135   :  { %848 = vmatpush3.bf16.msra.mxu1 %v887_v7 }
 0x136   :  { %849 = vmatprep.subr.bf16.mxu1 %v888_v8 }
 0x139   :  { %850 = vmatpush3.bf16.msra.mxu1 %v888_v8 }
 0x13a   :  { %851 = vmatprep.subr.bf16.mxu1 %v889_v9 }
 0x13d   :  { %852 = vmatpush3.bf16.msra.mxu1 %v889_v9 }
 0x1e0   :  { %v815_v12 = vpop.f32.mrf.mxu1 }
 0x1e1   :  { %v355_v19 = vmul.f32 %v815_v12, %v815_v12 }
 0x1e2   :  { %v329_v13 = vpop.f32.mrf.mxu1 }
 0x1e3   :  { %v353_v16 = vmul.f32 %v329_v13, %v329_v13 }
 0x1e4   :  { %v816_v14 = vpop.f32.mrf.mxu1 }
 0x1e5   :  { %v356_v22 = vmul.f32 %v816_v14, %v816_v14 }
 0x1e6   :  { %v332_v15 = vpop.f32.mrf.mxu1 }
 0x1e7   :  { %v344_v17 = vadd.f32 %v332_v15, %v329_v13  ;;  %v354_v18 = vmul.f32 %v332_v15, %v332_v15 }
 0x1e9   :  { %v345_v20 = vadd.f32 %v815_v12, %v344_v17  ;;  %v357_v21 = vadd.f32 %v354_v18, %v353_v16 }
 0x1eb   :  { %v346_v23 = vadd.f32 %v816_v14, %v345_v20  ;;  %v358_v24 = vadd.f32 %v357_v21, %v355_v19 }
 0x1ed   :  { %v347_v25 = vrot.slane %v346_v23, 4  ;;  %v359_v26 = vadd.f32 %v358_v24, %v356_v22 }
 0x1ef   :  { %v348_v27 = vadd.f32 %v347_v25, %v346_v23  ;;  %v360_v28 = vrot.slane %v359_v26, 4 }
 0x1f1   :  { %v349_v29 = vrot.slane %v348_v27, 2  ;;  %v361_v30 = vadd.f32 %v360_v28, %v359_v26 }
 0x1f3   :  { %v350_v31 = vadd.f32 %v349_v29, %v348_v27  ;;  %v362_v32 = vrot.slane %v361_v30, 2 }
 0x1f5   :  { %v351_v33 = vrot.slane %v350_v31, 1  ;;  %v363_v34 = vadd.f32 %v362_v32, %v361_v30 }
 0x1f7   :  { %v352_v35 = vadd.f32 %v351_v33, %v350_v31  ;;  %v364_v36 = vrot.slane %v363_v34, 1 }
 0x1f9   :  { %v365_v37 = vadd.f32 %v364_v36, %v363_v34  ;;  %v370_v38 = vmul.f32 0.05, %v352_v35 }
 0x1fb   :  { %v371_v39 = vmul.f32 0.05, %v365_v37  ;;  %v372_v40 = vmul.f32 %v370_v38, %v370_v38 }
 0x1fd   :  { %v373_v41 = vsub.f32 %v371_v39, %v372_v40 }
 0x1ff   :  { %v374_v42 = vmax.f32 %v373_v41, 0.0 }
 0x201   :  { %v375_v43 = vadd.f32 1e-05, %v374_v42  ;;  %v545_v42 = vld [vmem:[%s1112_s8] sm:$0x1] }
 0x203   :  { %892 = vrsqrt.f32 %v375_v43 }
 0x210   :  { %v893_v45 = vpop.eup %892 }
 0x211   :  { %v377_v47 = vmul.f32 %v893_v45, %v366_v44  ;;  %v546_v45 = vld [vmem:[%s1113_s9] sm:$0x1] }
 0x213   :  { %v378_v49 = vmul.f32 %v377_v47, %v370_v38  ;;  %v384_v50 = vrot.slane %v377_v47, %v1053_v46 }
 0x215   :  { %v379_v51 = vsub.f32 %v367_v48, %v378_v49  ;;  %v387_v52 = vmul.f32 %v384_v50, %v332_v15  ;;  %v388_v53 = vmul.f32 %v815_v12, %v384_v50  ;;  %v386_v55 = vmul.f32 %v384_v50, %v329_v13 }
 0x217   :  { %v394_v54 = vrot.slane %v379_v51, %v1053_v46 }
 0x219   :  { %v397_v56 = vadd.f32 %v394_v54, %v387_v52  ;;  %v396_v57 = vadd.f32 %v394_v54, %v386_v55  ;;  %v398_v58 = vadd.f32 %v394_v54, %v388_v53 }
 0x21b   :  { %v400_v59 = vmax.f32 %v396_v57, 0.0  ;;  %v401_v60 = vmax.f32 %v397_v56, 0.0  ;;  %v402_v61 = vmax.f32 %v398_v58, 0.0 }
 0x21d   :  { %v408_v62 = vpack.c.bf16 %v401_v60, %v400_v59  ;;  %v744_v63 = vpack.c.bf16 %v945_v2, %v402_v61 }
 0x21f   :  { %833 = vmatprep.mubr.bf16.mxu0 %v408_v62  ;;  %v746_v62 = vld [vmem:[%s1115_s11] ss:$0 sm:$0xff] }
 0x220   :  { %834 = vmatmul.mubr.msk.bf16.vlgmr.msra.gmra.mxu0 %vm1060_vm3, %v744_v63 }
 0x2e0   :  { %v835_v10 = vpop.f32.mrf.mxu0 }
 0x2e1   :  { %v534_v17 = vmul.f32 %v835_v10, %v835_v10 }
 0x2e2   :  { %v508_v11 = vpop.f32.mrf.mxu0 }
 0x2e3   :  { %v532_v14 = vmul.f32 %v508_v11, %v508_v11 }
 0x2e4   :  { %v836_v12 = vpop.f32.mrf.mxu0 }
 0x2e5   :  { %v535_v20 = vmul.f32 %v836_v12, %v836_v12 }
 0x2e6   :  { %v511_v13 = vpop.f32.mrf.mxu0 }
 0x2e7   :  { %v523_v15 = vadd.f32 %v511_v13, %v508_v11  ;;  %v533_v16 = vmul.f32 %v511_v13, %v511_v13 }
 0x2e9   :  { %v524_v18 = vadd.f32 %v835_v10, %v523_v15  ;;  %v536_v19 = vadd.f32 %v533_v16, %v532_v14 }
 0x2eb   :  { %v525_v21 = vadd.f32 %v836_v12, %v524_v18  ;;  %v537_v22 = vadd.f32 %v536_v19, %v534_v17 }
 0x2ed   :  { %v526_v23 = vrot.slane %v525_v21, 4  ;;  %v538_v24 = vadd.f32 %v537_v22, %v535_v20 }
 0x2ef   :  { %v527_v25 = vadd.f32 %v526_v23, %v525_v21  ;;  %v539_v26 = vrot.slane %v538_v24, 4 }
 0x2f1   :  { %v528_v27 = vrot.slane %v527_v25, 2  ;;  %v540_v28 = vadd.f32 %v539_v26, %v538_v24 }
 0x2f3   :  { %v529_v29 = vadd.f32 %v528_v27, %v527_v25  ;;  %v541_v30 = vrot.slane %v540_v28, 2 }
 0x2f5   :  { %v530_v31 = vrot.slane %v529_v29, 1  ;;  %v542_v32 = vadd.f32 %v541_v30, %v540_v28 }
 0x2f7   :  { %v531_v33 = vadd.f32 %v530_v31, %v529_v29  ;;  %v543_v34 = vrot.slane %v542_v32, 1 }
 0x2f9   :  { %v544_v35 = vadd.f32 %v543_v34, %v542_v32  ;;  %v549_v36 = vmul.f32 0.05, %v531_v33 }
 0x2fb   :  { %v550_v37 = vmul.f32 0.05, %v544_v35  ;;  %v551_v38 = vmul.f32 %v549_v36, %v549_v36 }
 0x2fd   :  { %v552_v39 = vsub.f32 %v550_v37, %v551_v38 }
 0x2ff   :  { %v553_v40 = vmax.f32 %v552_v39, 0.0 }
 0x301   :  { %v554_v41 = vadd.f32 1e-05, %v553_v40 }
 0x303   :  { %894 = vrsqrt.f32 %v554_v41 }
 0x310   :  { %v895_v43 = vpop.eup %894 }
 0x311   :  { %v556_v44 = vmul.f32 %v895_v43, %v545_v42 }
 0x313   :  { %v557_v47 = vmul.f32 %v556_v44, %v549_v36  ;;  %v563_v48 = vrot.slane %v556_v44, %v1053_v46 }
 0x315   :  { %v558_v49 = vsub.f32 %v546_v45, %v557_v47  ;;  %v566_v50 = vmul.f32 %v563_v48, %v511_v13  ;;  %v567_v51 = vmul.f32 %v835_v10, %v563_v48  ;;  %v565_v53 = vmul.f32 %v563_v48, %v508_v11 }
 0x317   :  { %v573_v52 = vrot.slane %v558_v49, %v1053_v46 }
 0x319   :  { %v576_v54 = vadd.f32 %v573_v52, %v566_v50  ;;  %v577_v55 = vadd.f32 %v573_v52, %v567_v51  ;;  %v575_v56 = vadd.f32 %v573_v52, %v565_v53 }
 0x31b   :  { %v580_v57 = vmax.f32 %v576_v54, 0.0  ;;  %v581_v58 = vmax.f32 %v577_v55, 0.0  ;;  %v579_v59 = vmax.f32 %v575_v56, 0.0 }
 0x31d   :  { %v587_v60 = vpack.c.bf16 %v580_v57, %v579_v59  ;;  %v756_v61 = vpack.c.bf16 %v945_v2, %v581_v58 }
 0x31f   :  { %853 = vmatprep.mubr.bf16.mxu1 %v587_v60 }
 0x320   :  { %854 = vmatmul.mubr.msk.bf16.vlgmr.msra.gmra.mxu1 %vm1060_vm3, %v756_v61 }
 0x3e0   :  { %v855_v63 = vpop.f32.mrf.mxu1 }
 0x3e1   :  { %v703_v46 = vadd.f32 %v855_v63, %v746_v62 }
 0x3e2   :  { %v694_v0 = vpop.f32.mrf.mxu1 }
 0x3e3   :  { %711 = vst [vmem:[%s1116_s12 + $0x10] sm:$0xff] %v703_v46  ;;  %v695_v3 = vadd.f32 %v746_v62, %v694_v0 }
 0x3e4   :  { %v856_v4 = vpop.f32.mrf.mxu1 }
 0x3e5   :  { %709 = vst [vmem:[%s1116_s12] sm:$0xff] %v695_v3  ;;  %v706_v2 = vadd.f32 %v856_v4, %v746_v62 }
 0x3e6   :  { %v697_v1 = vpop.f32.mrf.mxu1 }
 0x3e7   :  { %712 = vst [vmem:[%s1116_s12 + $0x18] sm:$0xff] %v706_v2  ;;  %v698_v5 = vadd.f32 %v746_v62, %v697_v1 }
 0x3e9   :  { %710 = vst [vmem:[%s1116_s12 + $0x8] sm:$0xff] %v698_v5 }
 0x3ea   :  { %717 = vsyncpa [#allocation3], 1 }
 0x3eb   :  { %718 = vsyncpa [#allocation5], 1 }

</bundles_post_ra>
